<compile_context>
chip_gen: v7x
topology: tpu7x:2x2x1
jax: 0.10.0
libtpu: 0.0.40
codegen_flags: <defaults>
</compile_context>

<pallas_src>
import math
import functools

import jax
import jax.numpy as jnp
from jax.experimental import pallas as pl
from jax.experimental.pallas import tpu as pltpu


_LANE = 128   # vreg lane width


def _pad_axis(a, axis, mult):
    pad = (-a.shape[axis]) % mult
    if pad == 0:
        return a
    widths = [(0, 0)] * a.ndim
    widths[axis] = (0, pad)
    return jnp.pad(a, widths)


# ----------------------------- fused kernel -------------------------------- #

def _make_gcn_kernel(nlayers):
    def kernel(x_ref, adj_ref, fc0_w_ref, fc0_b_ref, convs_ref,
               fc1_w_ref, fc1_b_ref, o_ref):
        # MXU operand dtype is whatever the prepared weights carry (bf16/f32).
        cdt = fc0_w_ref.dtype

        # fc0 + ReLU (bias/relu in f32)
        h = jnp.maximum(
            jnp.dot(x_ref[...].astype(cdt), fc0_w_ref[...],
                    preferred_element_type=jnp.float32) + fc0_b_ref[...],
            0.0)

        # graph-conv layers (nlayers static -> unrolled); adj resident in VMEM
        adj = adj_ref[...].astype(cdt)
        for i in range(nlayers):
            hi = jnp.dot(adj, h.astype(cdt), preferred_element_type=jnp.float32)
            h = jnp.maximum(
                jnp.dot(hi.astype(cdt), convs_ref[i],
                        preferred_element_type=jnp.float32),
                0.0)

        # final linear; padded class columns get -1e30 via the padded bias,
        # so no explicit mask is needed before the log-softmax.
        logits = jnp.dot(h.astype(cdt), fc1_w_ref[...],
                         preferred_element_type=jnp.float32) + fc1_b_ref[...]
        m = jnp.max(logits, axis=-1, keepdims=True)
        s = logits - m
        lse = jnp.log(jnp.sum(jnp.exp(s), axis=-1, keepdims=True))
        o_ref[...] = s - lse

    return kernel


# ----------------------------- param prep (once) ---------------------------- #

def prepare_params(params, compute_dtype=jnp.bfloat16):
    """Pad weights to 128-lane multiples ONCE (outside the per-call path).

    Weights are cast to `compute_dtype` (bf16 by default) for the MXU;
    biases stay f32.  fc1_b's padded class columns are set to -1e30 so the
    kernel needs no explicit class mask.
    """
    fc0_w, fc0_b, conv_ws, fc1_w, fc1_b = params

    fc0_w_p = _pad_axis(_pad_axis(fc0_w, 0, _LANE), 1, _LANE).astype(compute_dtype)
    fc0_b_p = _pad_axis(fc0_b.reshape(1, -1), 1, _LANE)
    convs_p = _pad_axis(_pad_axis(conv_ws, 1, _LANE), 2, _LANE).astype(compute_dtype)
    fc1_w_p = _pad_axis(_pad_axis(fc1_w, 0, _LANE), 1, _LANE).astype(compute_dtype)

    nclass = fc1_b.shape[0]
    cpad = (-nclass) % _LANE
    fc1_b_p = jnp.concatenate(
        [fc1_b.astype(jnp.float32),
         jnp.full((cpad,), -1e30, jnp.float32)]).reshape(1, -1)

    return fc0_w_p, fc0_b_p, convs_p, fc1_w_p, fc1_b_p


# ----------------------------- wrapper -------------------------------------- #

@functools.partial(jax.jit, static_argnames=("nclass",))
def gcn_forward(x, adj, prepared, nclass):
    fc0_w_p, fc0_b_p, convs_p, fc1_w_p, fc1_b_p = prepared
    nlayers = convs_p.shape[0]
    N = x.shape[0]

    # Only x and adj are padded per call; node dim padded to 128 lanes so the
    # adj contraction and the output slab are lane-dense.
    x_p = _pad_axis(_pad_axis(x, 1, _LANE), 0, _LANE)
    adj_p = _pad_axis(_pad_axis(adj, 0, _LANE), 1, _LANE)

    n_pad = x_p.shape[0]
    c_pad = fc1_w_p.shape[1]

    # Everything is tiny: single invocation, grid-free, all operands whole in
    # VMEM (no grid steps / emit_pipeline at this size).
    vmem = pl.BlockSpec(memory_space=pltpu.MemorySpace.VMEM)

    out_p = pl.pallas_call(
        _make_gcn_kernel(int(nlayers)),
        out_shape=jax.ShapeDtypeStruct((n_pad, c_pad), jnp.float32),
        in_specs=[vmem] * 7,
        out_specs=vmem,
    )(x_p, adj_p, fc0_w_p, fc0_b_p, convs_p, fc1_w_p, fc1_b_p)

    # NOTE: padded output columns hold ~-1e30; anything consuming out_p
    # unsliced must re-apply the class mask.
    return out_p[:N, :nclass]


# ----------------------------- param init ---------------------------------- #

def init_params(key, nfeat, nlayers, nhidden, nclass):
    keys = jax.random.split(key, nlayers + 4)

    # nn.Linear default init: U(-1/sqrt(fan_in), 1/sqrt(fan_in)) for w and b
    def linear_init(kw, kb, fan_in, fan_out):
        bound = 1.0 / math.sqrt(fan_in)
        w = jax.random.uniform(kw, (fan_in, fan_out), jnp.float32, -bound, bound)
        b = jax.random.uniform(kb, (fan_out,), jnp.float32, -bound, bound)
        return w, b

    fc0_w, fc0_b = linear_init(keys[0], keys[1], nfeat, nhidden)
    fc1_w, fc1_b = linear_init(keys[2], keys[3], nhidden, nclass)

    # GraphConvolution: U(-1/sqrt(out_features), 1/sqrt(out_features))
    stdv = 1.0 / math.sqrt(nhidden)
    conv_ws = jnp.stack([
        jax.random.uniform(keys[4 + i], (nhidden, nhidden), jnp.float32,
                           -stdv, stdv)
        for i in range(nlayers)
    ])
    return fc0_w, fc0_b, conv_ws, fc1_w, fc1_b


# ----------------------------- main ----------------------------------------- #

if __name__ == "__main__":
    N, nfeat, nlayers, nhidden, nclass = 16, 32, 2, 32, 8

    key = jax.random.PRNGKey(0)
    k_x, k_adj, k_p = jax.random.split(key, 3)

    x = jax.random.normal(k_x, (N, nfeat), jnp.float32)

    # symmetric normalized adjacency with self-loops (typical GCN input)
    a = (jax.random.uniform(k_adj, (N, N)) > 0.7).astype(jnp.float32)
    a = jnp.maximum(a, a.T) + jnp.eye(N, dtype=jnp.float32)
    deg = jnp.sum(a, axis=1)
    d_inv_sqrt = 1.0 / jnp.sqrt(deg)
    adj = a * d_inv_sqrt[:, None] * d_inv_sqrt[None, :]

    params = init_params(k_p, nfeat, nlayers, nhidden, nclass)

    # pure-JAX f32 reference
    fc0_w, fc0_b, conv_ws, fc1_w, fc1_b = params
    h_ref = jnp.maximum(x @ fc0_w + fc0_b, 0.0)
    for i in range(nlayers):
        h_ref = jnp.maximum((adj @ h_ref) @ conv_ws[i], 0.0)
    ref = jax.nn.log_softmax(h_ref @ fc1_w + fc1_b, axis=1)

    # ---- bf16-MXU path (default / production) ----
    prepared_bf16 = prepare_params(params, compute_dtype=jnp.bfloat16)
    out = gcn_forward(x, adj, prepared_bf16, nclass=nclass)
    jax.block_until_ready(out)

    assert out.shape == (N, nclass)
    assert bool(jnp.all(jnp.isfinite(out)))
    # rows of log_softmax exponentiate+sum to 1
    assert jnp.allclose(jnp.sum(jnp.exp(out), axis=1), 1.0, atol=1e-4)
    # bf16 dot operands -> looser tolerance vs f32 reference
    assert jnp.allclose(out, ref, atol=5e-2), float(jnp.max(jnp.abs(out - ref)))

    # ---- f32 path (tight reference check) ----
    prepared_f32 = prepare_params(params, compute_dtype=jnp.float32)
    out32 = gcn_forward(x, adj, prepared_f32, nclass=nclass)
    jax.block_until_ready(out32)
    assert jnp.allclose(out32, ref, atol=1e-4), float(jnp.max(jnp.abs(out32 - ref)))

    print("KERNEL_OK")
</pallas_src>

<mosaic_0001>
module attributes {stable_mosaic.version = 11 : i64} {
  func.func @kernel(%arg0: memref<128x128xf32, #tpu.memory_space<vmem>>, %arg1: memref<128x128xf32, #tpu.memory_space<vmem>>, %arg2: memref<128x128xbf16, #tpu.memory_space<vmem>>, %arg3: memref<1x128xf32, #tpu.memory_space<vmem>>, %arg4: memref<2x128x128xbf16, #tpu.memory_space<vmem>>, %arg5: memref<128x128xbf16, #tpu.memory_space<vmem>>, %arg6: memref<1x128xf32, #tpu.memory_space<vmem>>, %arg7: memref<128x128xf32, #tpu.memory_space<vmem>>) attributes {dimension_semantics = [], scalar_prefetch = 0 : i64, scratch_operands = 0 : i64, tpu.core_type = #tpu.core_type<tc>} {
    %c0 = arith.constant 0 : index
    %c0_0 = arith.constant 0 : index
    %0 = vector.load %arg0[%c0, %c0_0] : memref<128x128xf32, #tpu.memory_space<vmem>>, vector<128x128xf32>
    %1 = arith.truncf %0 : vector<128x128xf32> to vector<128x128xbf16>
    %c0_1 = arith.constant 0 : index
    %c0_2 = arith.constant 0 : index
    %2 = vector.load %arg2[%c0_1, %c0_2] : memref<128x128xbf16, #tpu.memory_space<vmem>>, vector<128x128xbf16>
    %cst = arith.constant dense<0.000000e+00> : vector<128x128xf32>
    %3 = tpu.matmul %1, %2, %cst {dimension_numbers = #tpu.dot_dimension_numbers<[1], [0], [0], [1], [0, 0, 1, 1], [], []>} : vector<128x128xbf16>, vector<128x128xbf16>, vector<128x128xf32> -> vector<128x128xf32>
    %c0_3 = arith.constant 0 : index
    %c0_4 = arith.constant 0 : index
    %4 = vector.load %arg3[%c0_3, %c0_4] : memref<1x128xf32, #tpu.memory_space<vmem>>, vector<1x128xf32>
    %5 = vector.broadcast %4 : vector<1x128xf32> to vector<128x128xf32>
    %6 = arith.addf %3, %5 : vector<128x128xf32>
    %cst_5 = arith.constant 0.000000e+00 : f32
    %7 = vector.broadcast %cst_5 : f32 to vector<128x128xf32>
    %8 = arith.maximumf %6, %7 : vector<128x128xf32>
    %c0_6 = arith.constant 0 : index
    %c0_7 = arith.constant 0 : index
    %9 = vector.load %arg1[%c0_6, %c0_7] : memref<128x128xf32, #tpu.memory_space<vmem>>, vector<128x128xf32>
    %10 = arith.truncf %9 : vector<128x128xf32> to vector<128x128xbf16>
    %11 = arith.truncf %8 : vector<128x128xf32> to vector<128x128xbf16>
    %cst_8 = arith.constant dense<0.000000e+00> : vector<128x128xf32>
    %12 = tpu.matmul %10, %11, %cst_8 {dimension_numbers = #tpu.dot_dimension_numbers<[1], [0], [0], [1], [0, 0, 1, 1], [], []>} : vector<128x128xbf16>, vector<128x128xbf16>, vector<128x128xf32> -> vector<128x128xf32>
    %13 = arith.truncf %12 : vector<128x128xf32> to vector<128x128xbf16>
    %c0_9 = arith.constant 0 : index
    %c0_10 = arith.constant 0 : index
    %c0_11 = arith.constant 0 : index
    %14 = vector.load %arg4[%c0_9, %c0_10, %c0_11] : memref<2x128x128xbf16, #tpu.memory_space<vmem>>, vector<1x128x128xbf16>
    %15 = vector.shape_cast %14 : vector<1x128x128xbf16> to vector<128x128xbf16>
    %cst_12 = arith.constant dense<0.000000e+00> : vector<128x128xf32>
    %16 = tpu.matmul %13, %15, %cst_12 {dimension_numbers = #tpu.dot_dimension_numbers<[1], [0], [0], [1], [0, 0, 1, 1], [], []>} : vector<128x128xbf16>, vector<128x128xbf16>, vector<128x128xf32> -> vector<128x128xf32>
    %cst_13 = arith.constant 0.000000e+00 : f32
    %17 = vector.broadcast %cst_13 : f32 to vector<128x128xf32>
    %18 = arith.maximumf %16, %17 : vector<128x128xf32>
    %19 = arith.truncf %18 : vector<128x128xf32> to vector<128x128xbf16>
    %cst_14 = arith.constant dense<0.000000e+00> : vector<128x128xf32>
    %20 = tpu.matmul %10, %19, %cst_14 {dimension_numbers = #tpu.dot_dimension_numbers<[1], [0], [0], [1], [0, 0, 1, 1], [], []>} : vector<128x128xbf16>, vector<128x128xbf16>, vector<128x128xf32> -> vector<128x128xf32>
    %21 = arith.truncf %20 : vector<128x128xf32> to vector<128x128xbf16>
    %c1 = arith.constant 1 : index
    %c0_15 = arith.constant 0 : index
    %c0_16 = arith.constant 0 : index
    %22 = vector.load %arg4[%c1, %c0_15, %c0_16] : memref<2x128x128xbf16, #tpu.memory_space<vmem>>, vector<1x128x128xbf16>
    %23 = vector.shape_cast %22 : vector<1x128x128xbf16> to vector<128x128xbf16>
    %cst_17 = arith.constant dense<0.000000e+00> : vector<128x128xf32>
    %24 = tpu.matmul %21, %23, %cst_17 {dimension_numbers = #tpu.dot_dimension_numbers<[1], [0], [0], [1], [0, 0, 1, 1], [], []>} : vector<128x128xbf16>, vector<128x128xbf16>, vector<128x128xf32> -> vector<128x128xf32>
    %cst_18 = arith.constant 0.000000e+00 : f32
    %25 = vector.broadcast %cst_18 : f32 to vector<128x128xf32>
    %26 = arith.maximumf %24, %25 : vector<128x128xf32>
    %27 = arith.truncf %26 : vector<128x128xf32> to vector<128x128xbf16>
    %c0_19 = arith.constant 0 : index
    %c0_20 = arith.constant 0 : index
    %28 = vector.load %arg5[%c0_19, %c0_20] : memref<128x128xbf16, #tpu.memory_space<vmem>>, vector<128x128xbf16>
    %cst_21 = arith.constant dense<0.000000e+00> : vector<128x128xf32>
    %29 = tpu.matmul %27, %28, %cst_21 {dimension_numbers = #tpu.dot_dimension_numbers<[1], [0], [0], [1], [0, 0, 1, 1], [], []>} : vector<128x128xbf16>, vector<128x128xbf16>, vector<128x128xf32> -> vector<128x128xf32>
    %c0_22 = arith.constant 0 : index
    %c0_23 = arith.constant 0 : index
    %30 = vector.load %arg6[%c0_22, %c0_23] : memref<1x128xf32, #tpu.memory_space<vmem>>, vector<1x128xf32>
    %31 = vector.broadcast %30 : vector<1x128xf32> to vector<128x128xf32>
    %32 = arith.addf %29, %31 : vector<128x128xf32>
    %cst_24 = arith.constant dense<0xFF800000> : vector<128xf32>
    %33 = vector.multi_reduction <maximumf>, %32, %cst_24 [1] : vector<128x128xf32> to vector<128xf32>
    %34 = vector.shape_cast %33 : vector<128xf32> to vector<128x1xf32>
    %35 = vector.broadcast %34 : vector<128x1xf32> to vector<128x128xf32>
    %36 = arith.subf %32, %35 : vector<128x128xf32>
    %37 = math.exp %36 : vector<128x128xf32>
    %cst_25 = arith.constant dense<0.000000e+00> : vector<128xf32>
    %38 = vector.multi_reduction <add>, %37, %cst_25 [1] : vector<128x128xf32> to vector<128xf32>
    %39 = vector.shape_cast %38 : vector<128xf32> to vector<128x1xf32>
    %40 = math.log %39 : vector<128x1xf32>
    %41 = vector.broadcast %40 : vector<128x1xf32> to vector<128x128xf32>
    %42 = arith.subf %36, %41 : vector<128x128xf32>
    %c0_26 = arith.constant 0 : index
    %c0_27 = arith.constant 0 : index
    %43 = vector.load %arg7[%c0_26, %c0_27] : memref<128x128xf32, #tpu.memory_space<vmem>>, vector<128x128xf32>
    tpu.vector_store %arg7[%c0_26, %c0_27], %42 {strides = array<i32>} : memref<128x128xf32, #tpu.memory_space<vmem>>, vector<128x128xf32>,
    return
  }
}

</mosaic_0001>

<bundles_post_ra>
// kernel: gcn_forward.1
= control target key start
LH: loop header
LB: loop body
LE: loop exit
PB: predicated region body
PF: predicated region fallthrough
CT: control target
= control target key end

     0   :  { %s2032_s2 = inlined_call_operand.vmem [shape: bf16[128,128], index: 2, kind: input, shape index: {}]   ;;  %s2033_s0 = inlined_call_operand.vmem [shape: f32[128,128], index: 0, kind: input, shape index: {}]   ;;  %s2034_s1 = inlined_call_operand.vmem [shape: f32[128,128], index: 1, kind: input, shape index: {}]   ;;  %s2035_s4 = inlined_call_operand.vmem [shape: bf16[2,128,128], index: 4, kind: input, shape index: {}]   ;;  %s2036_s3 = inlined_call_operand.vmem [shape: f32[1,128], index: 3, kind: input, shape index: {}]   ;;  %s2037_s5 = inlined_call_operand.vmem [shape: bf16[128,128], index: 5, kind: input, shape index: {}]   ;;  %s2038_s6 = inlined_call_operand.vmem [shape: f32[1,128], index: 6, kind: input, shape index: {}]   ;;  %s2039_s7 = inlined_call_operand.vmem [shape: f32[128,128], index: 7, kind: output, shape index: {}]  }
   0x1   :  { %v1534_v0 = vld [vmem:[%s2032_s2] sm:$0xff]   ;;  %v1535_v1 = vld [vmem:[%s2032_s2 + $0x8] sm:$0xff]   ;;  %v1536_v2 = vld [vmem:[%s2032_s2 + $0x10] sm:$0xff]  }
   0x2   :  { %1342 = vmatprep.subr.bf16.mxu0 %v1534_v0  ;;  %v1537_v3 = vld [vmem:[%s2032_s2 + $0x18] sm:$0xff]   ;;  %v27_v4 = vld [vmem:[%s2033_s0] sm:$0xff]  ;;  %v28_v5 = vld [vmem:[%s2033_s0 + $0x8] sm:$0xff] }
   0x3   :  { %1343 = vmatpush3.bf16.msra.mxu0 %v1534_v0  ;;  %v43_v6 = vpack.c.bf16 %v28_v5, %v27_v4  ;;  %v1538_v7 = vld [vmem:[%s2032_s2 + $0x20] sm:$0xff]   ;;  %v1539_v8 = vld [vmem:[%s2032_s2 + $0x28] sm:$0xff]   ;;  %v1540_v9 = vld [vmem:[%s2032_s2 + $0x30] sm:$0xff]  }
   0x4   :  { %1344 = vmatprep.subr.bf16.mxu0 %v1535_v1  ;;  %v1541_v10 = vld [vmem:[%s2032_s2 + $0x38] sm:$0xff]   ;;  %v29_v11 = vld [vmem:[%s2033_s0 + $0x10] sm:$0xff]  ;;  %v31_v13 = vld [vmem:[%s2033_s0 + $0x20] sm:$0xff] }
   0x5   :  { %1358 = vmatprep.mubr.bf16.mxu0 %v43_v6  ;;  %v30_v12 = vld [vmem:[%s2033_s0 + $0x18] sm:$0xff]  ;;  %v32_v14 = vld [vmem:[%s2033_s0 + $0x28] sm:$0xff]  ;;  %v33_v17 = vld [vmem:[%s2033_s0 + $0x30] sm:$0xff] }
   0x6   :  { %v44_v15 = vpack.c.bf16 %v30_v12, %v29_v11  ;;  %v45_v16 = vpack.c.bf16 %v32_v14, %v31_v13  ;;  %v34_v18 = vld [vmem:[%s2033_s0 + $0x38] sm:$0xff]  ;;  %v35_v19 = vld [vmem:[%s2033_s0 + $0x40] sm:$0xff]  ;;  %v36_v20 = vld [vmem:[%s2033_s0 + $0x48] sm:$0xff] }
   0x7   :  { %1345 = vmatpush3.bf16.msra.mxu0 %v1535_v1  ;;  %v46_v21 = vpack.c.bf16 %v34_v18, %v33_v17  ;;  %v47_v22 = vpack.c.bf16 %v36_v20, %v35_v19  ;;  %v37_v23 = vld [vmem:[%s2033_s0 + $0x50] sm:$0xff]  ;;  %v38_v24 = vld [vmem:[%s2033_s0 + $0x58] sm:$0xff]  ;;  %v39_v25 = vld [vmem:[%s2033_s0 + $0x60] sm:$0xff] }
   0x8   :  { %1346 = vmatprep.subr.bf16.mxu0 %v1536_v2  ;;  %v40_v26 = vld [vmem:[%s2033_s0 + $0x68] sm:$0xff]  ;;  %v48_v27 = vpack.c.bf16 %v38_v24, %v37_v23  ;;  %v41_v29 = vld [vmem:[%s2033_s0 + $0x70] sm:$0xff]  ;;  %v42_v30 = vld [vmem:[%s2033_s0 + $0x78] sm:$0xff] }
   0x9   :  { %v49_v28 = vpack.c.bf16 %v40_v26, %v39_v25  ;;  %v50_v31 = vpack.c.bf16 %v42_v30, %v41_v29  ;;  %v235_v32 = vld [vmem:[%s2034_s1] sm:$0xff]  ;;  %v236_v33 = vld [vmem:[%s2034_s1 + $0x8] sm:$0xff]  ;;  %v1544_v37 = vld [vmem:[%s2035_s4 + $0x10] sm:$0xff]  }
   0xa   :  { %v1748_v34 = vpack.c.bf16 %v236_v33, %v235_v32  ;;  %v1542_v35 = vld [vmem:[%s2035_s4] sm:$0xff]   ;;  %v1543_v36 = vld [vmem:[%s2035_s4 + $0x8] sm:$0xff]   ;;  %v1545_v38 = vld [vmem:[%s2035_s4 + $0x18] sm:$0xff]  }
   0xb   :  { %1347 = vmatpush3.bf16.msra.mxu0 %v1536_v2  ;;  %v1546_v39 = vld [vmem:[%s2035_s4 + $0x20] sm:$0xff]   ;;  %v1547_v40 = vld [vmem:[%s2035_s4 + $0x28] sm:$0xff]   ;;  %v1548_v41 = vld [vmem:[%s2035_s4 + $0x30] sm:$0xff]  }
   0xc   :  { %1348 = vmatprep.subr.bf16.mxu0 %v1537_v3  ;;  %1390 = vmatprep.mubr.bf16.mxu1 %v1748_v34  ;;  %v1196_v42 = vld [vmem:[%s2036_s3] ss:$0 sm:$0xff] }
   0xf   :  { %1349 = vmatpush3.bf16.msra.mxu0 %v1537_v3 }
  0x10   :  { %1350 = vmatprep.subr.bf16.mxu0 %v1538_v7 }
  0x13   :  { %1351 = vmatpush3.bf16.msra.mxu0 %v1538_v7 }
  0x14   :  { %1352 = vmatprep.subr.bf16.mxu0 %v1539_v8 }
  0x17   :  { %1353 = vmatpush3.bf16.msra.mxu0 %v1539_v8 }
  0x18   :  { %1354 = vmatprep.subr.bf16.mxu0 %v1540_v9 }
  0x1b   :  { %1355 = vmatpush3.bf16.msra.mxu0 %v1540_v9 }
  0x1c   :  { %1356 = vmatprep.subr.bf16.mxu0 %v1541_v10 }
  0x1f   :  { %1357 = vmatpush3.bf16.msra.mxu0 %v1541_v10 }
  0x20   :  { %1406 = vmatprep.subr.bf16.mxu0 %v1542_v35 }
  0x22   :  { %1359 = vmatmul.mubr.bf16.vlgmr.msra.gmra.mrb[0].mxu0 %v44_v15 }
  0x23   :  { %1362 = vmatprep.mubr.bf16.mxu0 %v45_v16  ;;  %1407 = vmatpush3.bf16.msra.mxu0 %v1542_v35 }
  0x24   :  { %1408 = vmatprep.subr.bf16.mxu0 %v1543_v36 }
  0x27   :  { %1409 = vmatpush3.bf16.msra.mxu0 %v1543_v36  ;;  %v237_v36 = vld [vmem:[%s2034_s1 + $0x10] sm:$0xff] }
  0x28   :  { %1410 = vmatprep.subr.bf16.mxu0 %v1544_v37 }
  0x2a   :  { %1363 = vmatmul.mubr.bf16.gmra.mrb[4].mxu0 %v46_v21 }
  0x2b   :  { %1366 = vmatprep.mubr.bf16.mxu0 %v47_v22  ;;  %1411 = vmatpush3.bf16.msra.mxu0 %v1544_v37  ;;  %v238_v37 = vld [vmem:[%s2034_s1 + $0x18] sm:$0xff] }
  0x2c   :  { %1412 = vmatprep.subr.bf16.mxu0 %v1545_v38 }
  0x2f   :  { %1413 = vmatpush3.bf16.msra.mxu0 %v1545_v38  ;;  %v239_v38 = vld [vmem:[%s2034_s1 + $0x20] sm:$0xff] }
  0x30   :  { %1414 = vmatprep.subr.bf16.mxu0 %v1546_v39 }
  0x32   :  { %1367 = vmatmul.mubr.bf16.gmra.mrb[8].mxu0 %v48_v27 }
  0x33   :  { %1370 = vmatprep.mubr.bf16.mxu0 %v49_v28  ;;  %1415 = vmatpush3.bf16.msra.mxu0 %v1546_v39  ;;  %v240_v39 = vld [vmem:[%s2034_s1 + $0x28] sm:$0xff] }
  0x34   :  { %1416 = vmatprep.subr.bf16.mxu0 %v1547_v40 }
  0x37   :  { %1417 = vmatpush3.bf16.msra.mxu0 %v1547_v40  ;;  %v1787_v40 = vpack.c.bf16 %v238_v37, %v237_v36 }
  0x38   :  { %1418 = vmatprep.subr.bf16.mxu0 %v1548_v41 }
  0x3a   :  { %1371 = vmatmul.mubr.bf16.gmra.mrb[12].mxu0 %v50_v31 }
  0x3b   :  { %1419 = vmatpush3.bf16.msra.mxu0 %v1548_v41  ;;  %v1789_v41 = vpack.c.bf16 %v240_v39, %v239_v38 }
  0xf5   :  { %v1360_v43 = vpop.f32.mrb[0].mxu0 }
  0xf6   :  { %v165_v44 = vadd.f32 %v1360_v43, %v1196_v42  ;;  %v156_v45 = vpop.f32.mrb[1].mxu0  ;;  %v242_v43 = vld [vmem:[%s2034_s1 + $0x38] sm:$0xff] }
  0xf7   :  { %v157_v46 = vadd.f32 %v1196_v42, %v156_v45  ;;  %v1361_v47 = vpop.f32.mrb[2].mxu0  ;;  %v244_v45 = vld [vmem:[%s2034_s1 + $0x48] sm:$0xff] }
  0xf8   :  { %v168_v48 = vadd.f32 %v1361_v47, %v1196_v42  ;;  %v159_v49 = vpop.f32.mrb[3].mxu0  ;;  %v221_v51 = vmax.f32 %v165_v44, 0.0  ;;  %v243_v44 = vld [vmem:[%s2034_s1 + $0x40] sm:$0xff] }
  0xf9   :  { %v160_v50 = vadd.f32 %v1196_v42, %v159_v49  ;;  %v219_v53 = vmax.f32 %v157_v46, 0.0  ;;  %v1807_v47 = vpack.c.bf16 %v244_v45, %v243_v44  ;;  %v246_v49 = vld [vmem:[%s2034_s1 + $0x58] sm:$0xff] }
  0xfa   :  { %v222_v52 = vmax.f32 %v168_v48, 0.0  ;;  %v245_v48 = vld [vmem:[%s2034_s1 + $0x50] sm:$0xff] }
  0xfb   :  { %v220_v54 = vmax.f32 %v160_v50, 0.0  ;;  %v247_v50 = vld [vmem:[%s2034_s1 + $0x60] sm:$0xff] }
  0xfc   :  { %v260_v55 = vpack.c.bf16 %v222_v52, %v221_v51  ;;  %v248_v51 = vld [vmem:[%s2034_s1 + $0x68] sm:$0xff]  ;;  %v1823_v52 = vpack.c.bf16 %v246_v49, %v245_v48 }
  0xfd   :  { %v1364_v56 = vpop.f32.mrb[4].mxu0  ;;  %v259_v57 = vpack.c.bf16 %v220_v54, %v219_v53  ;;  %v1825_v53 = vpack.c.bf16 %v248_v51, %v247_v50  ;;  %v249_v54 = vld [vmem:[%s2034_s1 + $0x70] sm:$0xff] }
  0xfe   :  { %v181_v58 = vadd.f32 %v1364_v56, %v1196_v42  ;;  %v172_v59 = vpop.f32.mrb[5].mxu0 }
  0xff   :  { %v173_v60 = vadd.f32 %v1196_v42, %v172_v59  ;;  %v1365_v61 = vpop.f32.mrb[6].mxu0  ;;  %1374 = vmatprep.subr.bf16.mxu1 %v259_v57 }
 0x100   :  { %v184_v62 = vadd.f32 %v1365_v61, %v1196_v42  ;;  %v175_v63 = vpop.f32.mrb[7].mxu0  ;;  %1375 = vmatpush3.bf16.msra.mxu1 %v259_v57  ;;  %v225_v1 = vmax.f32 %v181_v58, 0.0  ;;  %v1549_v57 = vld [vmem:[%s2035_s4 + $0x38] sm:$0xff]  }
 0x101   :  { %v176_v0 = vadd.f32 %v1196_v42, %v175_v63  ;;  %1376 = vmatprep.subr.bf16.mxu1 %v260_v55  ;;  %v223_v3 = vmax.f32 %v173_v60, 0.0  ;;  %1420 = vmatprep.subr.bf16.mxu0 %v1549_v57 }
 0x102   :  { %v226_v2 = vmax.f32 %v184_v62, 0.0  ;;  %1421 = vmatpush3.bf16.msra.mxu0 %v1549_v57 }
 0x103   :  { %v224_v4 = vmax.f32 %v176_v0, 0.0 }
 0x104   :  { %v262_v5 = vpack.c.bf16 %v226_v2, %v225_v1  ;;  %1377 = vmatpush3.bf16.msra.mxu1 %v260_v55  ;;  %v250_v55 = vld [vmem:[%s2034_s1 + $0x78] sm:$0xff] }
 0x105   :  { %v261_v6 = vpack.c.bf16 %v224_v4, %v223_v3  ;;  %v1368_v7 = vpop.f32.mrb[8].mxu0  ;;  %v1835_v56 = vpack.c.bf16 %v250_v55, %v249_v54 }
 0x106   :  { %v197_v8 = vadd.f32 %v1368_v7, %v1196_v42  ;;  %v188_v9 = vpop.f32.mrb[9].mxu0 }
 0x107   :  { %v189_v10 = vadd.f32 %v1196_v42, %v188_v9  ;;  %v1369_v11 = vpop.f32.mrb[10].mxu0  ;;  %1378 = vmatprep.subr.bf16.mxu1 %v261_v6 }
 0x108   :  { %v200_v12 = vadd.f32 %v1369_v11, %v1196_v42  ;;  %v191_v13 = vpop.f32.mrb[11].mxu0  ;;  %1379 = vmatpush3.bf16.msra.mxu1 %v261_v6  ;;  %v229_v15 = vmax.f32 %v197_v8, 0.0 }
 0x109   :  { %v192_v14 = vadd.f32 %v1196_v42, %v191_v13  ;;  %1380 = vmatprep.subr.bf16.mxu1 %v262_v5  ;;  %v227_v17 = vmax.f32 %v189_v10, 0.0 }
 0x10a   :  { %v230_v16 = vmax.f32 %v200_v12, 0.0 }
 0x10b   :  { %v228_v18 = vmax.f32 %v192_v14, 0.0 }
 0x10c   :  { %v264_v19 = vpack.c.bf16 %v230_v16, %v229_v15  ;;  %1381 = vmatpush3.bf16.msra.mxu1 %v262_v5 }
 0x10d   :  { %v263_v20 = vpack.c.bf16 %v228_v18, %v227_v17  ;;  %v1372_v21 = vpop.f32.mrb[12].mxu0  ;;  %v1550_v17 = vld [vmem:[%s2035_s4 + $0x40] sm:$0xff]   ;;  %v1551_v18 = vld [vmem:[%s2035_s4 + $0x48] sm:$0xff]  }
 0x10e   :  { %v213_v22 = vadd.f32 %v1372_v21, %v1196_v42  ;;  %v204_v23 = vpop.f32.mrb[13].mxu0  ;;  %1470 = vmatprep.subr.bf16.mxu0 %v1550_v17  ;;  %v1554_v21 = vld [vmem:[%s2035_s4 + $0x60] sm:$0xff]  }
 0x10f   :  { %v205_v24 = vadd.f32 %v1196_v42, %v204_v23  ;;  %v1373_v25 = vpop.f32.mrb[14].mxu0  ;;  %1382 = vmatprep.subr.bf16.mxu1 %v263_v20  ;;  %v1556_v23 = vld [vmem:[%s2035_s4 + $0x70] sm:$0xff]  }
 0x110   :  { %v216_v26 = vadd.f32 %v1373_v25, %v1196_v42  ;;  %v207_v27 = vpop.f32.mrb[15].mxu0  ;;  %1383 = vmatpush3.bf16.msra.mxu1 %v263_v20  ;;  %v233_v29 = vmax.f32 %v213_v22, 0.0  ;;  %v1553_v20 = vld [vmem:[%s2035_s4 + $0x58] sm:$0xff]   ;;  %v1555_v22 = vld [vmem:[%s2035_s4 + $0x68] sm:$0xff]  }
 0x111   :  { %v208_v28 = vadd.f32 %v1196_v42, %v207_v27  ;;  %1384 = vmatprep.subr.bf16.mxu1 %v264_v19  ;;  %v231_v31 = vmax.f32 %v205_v24, 0.0  ;;  %v241_v42 = vld [vmem:[%s2034_s1 + $0x30] sm:$0xff] }
 0x112   :  { %v234_v30 = vmax.f32 %v216_v26, 0.0  ;;  %v1805_v46 = vpack.c.bf16 %v242_v43, %v241_v42 }
 0x113   :  { %v232_v32 = vmax.f32 %v208_v28, 0.0 }
 0x114   :  { %v266_v33 = vpack.c.bf16 %v234_v30, %v233_v29  ;;  %1385 = vmatpush3.bf16.msra.mxu1 %v264_v19  ;;  %v1552_v19 = vld [vmem:[%s2035_s4 + $0x50] sm:$0xff]  }
 0x115   :  { %v265_v35 = vpack.c.bf16 %v232_v32, %v231_v31 }
 0x117   :  { %1386 = vmatprep.subr.bf16.mxu1 %v265_v35 }
 0x118   :  { %1387 = vmatpush3.bf16.msra.mxu1 %v265_v35 }
 0x119   :  { %1388 = vmatprep.subr.bf16.mxu1 %v266_v33 }
 0x11c   :  { %1389 = vmatpush3.bf16.msra.mxu1 %v266_v33 }
 0x11f   :  { %1391 = vmatmul.mubr.bf16.vlgmr.msra.gmra.mrb[0].mxu1 %v1787_v40 }
 0x120   :  { %1394 = vmatprep.mubr.bf16.mxu1 %v1789_v41 }
 0x127   :  { %1395 = vmatmul.mubr.bf16.gmra.mrb[4].mxu1 %v1805_v46 }
 0x128   :  { %1398 = vmatprep.mubr.bf16.mxu1 %v1807_v47 }
 0x12f   :  { %1399 = vmatmul.mubr.bf16.gmra.mrb[8].mxu1 %v1823_v52 }
 0x130   :  { %1402 = vmatprep.mubr.bf16.mxu1 %v1825_v53 }
 0x137   :  { %1403 = vmatmul.mubr.bf16.gmra.mrb[12].mxu1 %v1835_v56 }
 0x138   :  { %1454 = vmatprep.mubr.bf16.mxu1 %v1748_v34 }
 0x1f2   :  { %v1392_v58 = vpop.f32.mrb[0].mxu1 }
 0x1f3   :  { %v301_v59 = vpop.f32.mrb[1].mxu1 }
 0x1f4   :  { %v1393_v60 = vpop.f32.mrb[2].mxu1 }
 0x1f5   :  { %v365_v61 = vpack.c.bf16 %v1393_v60, %v1392_v58  ;;  %v304_v62 = vpop.f32.mrb[3].mxu1 }
 0x1f6   :  { %v364_v63 = vpack.c.bf16 %v304_v62, %v301_v59 }
 0x1f8   :  { %1422 = vmatprep.mubr.bf16.mxu0 %v364_v63 }
 0x1f9   :  { %1423 = vmatmul.mubr.bf16.vlgmr.msra.gmra.mrb[16].mxu0 %v365_v61 }
 0x1fa   :  { %v1396_v0 = vpop.f32.mrb[4].mxu1  ;;  %1471 = vmatpush3.bf16.msra.mxu0 %v1550_v17 }
 0x1fb   :  { %v317_v1 = vpop.f32.mrb[5].mxu1  ;;  %1472 = vmatprep.subr.bf16.mxu0 %v1551_v18 }
 0x1fc   :  { %v1397_v2 = vpop.f32.mrb[6].mxu1 }
 0x1fd   :  { %v367_v3 = vpack.c.bf16 %v1397_v2, %v1396_v0  ;;  %v320_v4 = vpop.f32.mrb[7].mxu1 }
 0x1fe   :  { %v366_v34 = vpack.c.bf16 %v320_v4, %v317_v1  ;;  %1473 = vmatpush3.bf16.msra.mxu0 %v1551_v18 }
 0x1ff   :  { %1474 = vmatprep.subr.bf16.mxu0 %v1552_v19 }
 0x200   :  { %1426 = vmatprep.mubr.bf16.mxu0 %v366_v34 }
 0x201   :  { %1427 = vmatmul.mubr.bf16.gmra.mrb[20].mxu0 %v367_v3 }
 0x202   :  { %v1400_v5 = vpop.f32.mrb[8].mxu1  ;;  %1475 = vmatpush3.bf16.msra.mxu0 %v1552_v19 }
 0x203   :  { %v333_v6 = vpop.f32.mrb[9].mxu1  ;;  %1476 = vmatprep.subr.bf16.mxu0 %v1553_v20 }
 0x204   :  { %v1401_v7 = vpop.f32.mrb[10].mxu1 }
 0x205   :  { %v369_v8 = vpack.c.bf16 %v1401_v7, %v1400_v5  ;;  %v336_v9 = vpop.f32.mrb[11].mxu1  ;;  %v1557_v7 = vld [vmem:[%s2035_s4 + $0x78] sm:$0xff]  }
 0x206   :  { %v368_v10 = vpack.c.bf16 %v336_v9, %v333_v6  ;;  %1477 = vmatpush3.bf16.msra.mxu0 %v1553_v20 }
 0x207   :  { %1478 = vmatprep.subr.bf16.mxu0 %v1554_v21 }
 0x208   :  { %1430 = vmatprep.mubr.bf16.mxu0 %v368_v10 }
 0x209   :  { %1431 = vmatmul.mubr.bf16.gmra.mrb[24].mxu0 %v369_v8 }
 0x20a   :  { %v1404_v11 = vpop.f32.mrb[12].mxu1  ;;  %1479 = vmatpush3.bf16.msra.mxu0 %v1554_v21 }
 0x20b   :  { %v349_v12 = vpop.f32.mrb[13].mxu1  ;;  %1480 = vmatprep.subr.bf16.mxu0 %v1555_v22 }
 0x20c   :  { %v1405_v13 = vpop.f32.mrb[14].mxu1 }
 0x20d   :  { %v371_v14 = vpack.c.bf16 %v1405_v13, %v1404_v11  ;;  %v352_v15 = vpop.f32.mrb[15].mxu1 }
 0x20e   :  { %v370_v16 = vpack.c.bf16 %v352_v15, %v349_v12  ;;  %1481 = vmatpush3.bf16.msra.mxu0 %v1555_v22 }
 0x20f   :  { %1482 = vmatprep.subr.bf16.mxu0 %v1556_v23 }
 0x210   :  { %1434 = vmatprep.mubr.bf16.mxu0 %v370_v16 }
 0x211   :  { %1435 = vmatmul.mubr.bf16.gmra.mrb[28].mxu0 %v371_v14 }
 0x212   :  { %1483 = vmatpush3.bf16.msra.mxu0 %v1556_v23 }
 0x213   :  { %1484 = vmatprep.subr.bf16.mxu0 %v1557_v7 }
 0x216   :  { %1485 = vmatpush3.bf16.msra.mxu0 %v1557_v7 }
 0x2cc   :  { %v1424_v24 = vpop.f32.mrb[16].mxu0 }
 0x2cd   :  { %v470_v25 = vpop.f32.mrb[17].mxu0  ;;  %v535_v27 = vmax.f32 %v1424_v24, 0.0 }
 0x2ce   :  { %v1425_v26 = vpop.f32.mrb[18].mxu0  ;;  %v533_v30 = vmax.f32 %v470_v25, 0.0 }
 0x2cf   :  { %v536_v28 = vmax.f32 %v1425_v26, 0.0  ;;  %v473_v29 = vpop.f32.mrb[19].mxu0 }
 0x2d0   :  { %v534_v31 = vmax.f32 %v473_v29, 0.0 }
 0x2d1   :  { %v550_v32 = vpack.c.bf16 %v536_v28, %v535_v27 }
 0x2d2   :  { %v549_v33 = vpack.c.bf16 %v534_v31, %v533_v30  ;;  %v1564_v31 = vld [vmem:[%s2037_s5 + $0x30] sm:$0xff]  }
 0x2d4   :  { %v1428_v35 = vpop.f32.mrb[20].mxu0  ;;  %1438 = vmatprep.subr.bf16.mxu1 %v549_v33 }
 0x2d5   :  { %v486_v36 = vpop.f32.mrb[21].mxu0  ;;  %1439 = vmatpush3.bf16.msra.mxu1 %v549_v33  ;;  %v539_v38 = vmax.f32 %v1428_v35, 0.0 }
 0x2d6   :  { %v1429_v37 = vpop.f32.mrb[22].mxu0  ;;  %1440 = vmatprep.subr.bf16.mxu1 %v550_v32  ;;  %v537_v43 = vmax.f32 %v486_v36, 0.0 }
 0x2d7   :  { %v540_v39 = vmax.f32 %v1429_v37, 0.0  ;;  %v489_v42 = vpop.f32.mrb[23].mxu0 }
 0x2d8   :  { %v538_v44 = vmax.f32 %v489_v42, 0.0 }
 0x2d9   :  { %v552_v45 = vpack.c.bf16 %v540_v39, %v539_v38  ;;  %1441 = vmatpush3.bf16.msra.mxu1 %v550_v32  ;;  %v1565_v32 = vld [vmem:[%s2037_s5 + $0x38] sm:$0xff]  }
 0x2da   :  { %v551_v48 = vpack.c.bf16 %v538_v44, %v537_v43 }
 0x2dc   :  { %v1432_v49 = vpop.f32.mrb[24].mxu0  ;;  %1442 = vmatprep.subr.bf16.mxu1 %v551_v48 }
 0x2dd   :  { %v502_v50 = vpop.f32.mrb[25].mxu0  ;;  %1443 = vmatpush3.bf16.msra.mxu1 %v551_v48  ;;  %v543_v54 = vmax.f32 %v1432_v49, 0.0 }
 0x2de   :  { %v1433_v51 = vpop.f32.mrb[26].mxu0  ;;  %1444 = vmatprep.subr.bf16.mxu1 %v552_v45  ;;  %v541_v58 = vmax.f32 %v502_v50, 0.0 }
 0x2df   :  { %v544_v55 = vmax.f32 %v1433_v51, 0.0  ;;  %v505_v57 = vpop.f32.mrb[27].mxu0 }
 0x2e0   :  { %v542_v59 = vmax.f32 %v505_v57, 0.0 }
 0x2e1   :  { %v554_v60 = vpack.c.bf16 %v544_v55, %v543_v54  ;;  %1445 = vmatpush3.bf16.msra.mxu1 %v552_v45 }
 0x2e2   :  { %v553_v61 = vpack.c.bf16 %v542_v59, %v541_v58 }
 0x2e4   :  { %v1436_v62 = vpop.f32.mrb[28].mxu0  ;;  %1446 = vmatprep.subr.bf16.mxu1 %v553_v61 }
 0x2e5   :  { %v518_v63 = vpop.f32.mrb[29].mxu0  ;;  %1447 = vmatpush3.bf16.msra.mxu1 %v553_v61  ;;  %v547_v1 = vmax.f32 %v1436_v62, 0.0 }
 0x2e6   :  { %v1437_v0 = vpop.f32.mrb[30].mxu0  ;;  %1448 = vmatprep.subr.bf16.mxu1 %v554_v60  ;;  %v545_v4 = vmax.f32 %v518_v63, 0.0 }
 0x2e7   :  { %v548_v2 = vmax.f32 %v1437_v0, 0.0  ;;  %v521_v3 = vpop.f32.mrb[31].mxu0 }
 0x2e8   :  { %v546_v34 = vmax.f32 %v521_v3, 0.0 }
 0x2e9   :  { %v556_v5 = vpack.c.bf16 %v548_v2, %v547_v1  ;;  %1449 = vmatpush3.bf16.msra.mxu1 %v554_v60 }
 0x2ea   :  { %v555_v6 = vpack.c.bf16 %v546_v34, %v545_v4 }
 0x2ec   :  { %1450 = vmatprep.subr.bf16.mxu1 %v555_v6 }
 0x2ed   :  { %1451 = vmatpush3.bf16.msra.mxu1 %v555_v6 }
 0x2ee   :  { %1452 = vmatprep.subr.bf16.mxu1 %v556_v5 }
 0x2f1   :  { %1453 = vmatpush3.bf16.msra.mxu1 %v556_v5 }
 0x2f4   :  { %1455 = vmatmul.mubr.bf16.vlgmr.msra.gmra.mrb[16].mxu1 %v1787_v40  ;;  %v1558_v40 = vld [vmem:[%s2037_s5] sm:$0xff]  }
 0x2f5   :  { %1458 = vmatprep.mubr.bf16.mxu1 %v1789_v41  ;;  %v1559_v41 = vld [vmem:[%s2037_s5 + $0x8] sm:$0xff]   ;;  %1502 = vmatprep.subr.bf16.mxu1 %v1558_v40 }
 0x2f6   :  { %1503 = vmatpush3.bf16.msra.mxu1 %v1558_v40 }
 0x2f7   :  { %1504 = vmatprep.subr.bf16.mxu1 %v1559_v41 }
 0x2fa   :  { %1505 = vmatpush3.bf16.msra.mxu1 %v1559_v41 }
 0x2fc   :  { %1459 = vmatmul.mubr.bf16.gmra.mrb[20].mxu1 %v1805_v46  ;;  %v1560_v46 = vld [vmem:[%s2037_s5 + $0x10] sm:$0xff]  }
 0x2fd   :  { %1462 = vmatprep.mubr.bf16.mxu1 %v1807_v47  ;;  %1506 = vmatprep.subr.bf16.mxu1 %v1560_v46  ;;  %v1561_v47 = vld [vmem:[%s2037_s5 + $0x18] sm:$0xff]  }
 0x2fe   :  { %1507 = vmatpush3.bf16.msra.mxu1 %v1560_v46 }
 0x2ff   :  { %1508 = vmatprep.subr.bf16.mxu1 %v1561_v47 }
 0x302   :  { %1509 = vmatpush3.bf16.msra.mxu1 %v1561_v47 }
 0x304   :  { %1463 = vmatmul.mubr.bf16.gmra.mrb[24].mxu1 %v1823_v52  ;;  %v1562_v52 = vld [vmem:[%s2037_s5 + $0x20] sm:$0xff]  }
 0x305   :  { %1466 = vmatprep.mubr.bf16.mxu1 %v1825_v53  ;;  %1510 = vmatprep.subr.bf16.mxu1 %v1562_v52  ;;  %v1563_v53 = vld [vmem:[%s2037_s5 + $0x28] sm:$0xff]  }
 0x306   :  { %1511 = vmatpush3.bf16.msra.mxu1 %v1562_v52 }
 0x307   :  { %1512 = vmatprep.subr.bf16.mxu1 %v1563_v53 }
 0x30a   :  { %1513 = vmatpush3.bf16.msra.mxu1 %v1563_v53 }
 0x30b   :  { %1514 = vmatprep.subr.bf16.mxu1 %v1564_v31 }
 0x30c   :  { %1467 = vmatmul.mubr.bf16.gmra.mrb[28].mxu1 %v1835_v56 }
 0x30e   :  { %1515 = vmatpush3.bf16.msra.mxu1 %v1564_v31 }
 0x30f   :  { %1516 = vmatprep.subr.bf16.mxu1 %v1565_v32 }
 0x312   :  { %1517 = vmatpush3.bf16.msra.mxu1 %v1565_v32 }
 0x3c7   :  { %v1456_v56 = vpop.f32.mrb[16].mxu1 }
 0x3c8   :  { %v591_v8 = vpop.f32.mrb[17].mxu1 }
 0x3c9   :  { %v1457_v9 = vpop.f32.mrb[18].mxu1 }
 0x3ca   :  { %v655_v10 = vpack.c.bf16 %v1457_v9, %v1456_v56  ;;  %v594_v11 = vpop.f32.mrb[19].mxu1  ;;  %v1237_v9 = vld [vmem:[%s2038_s6] ss:$0 sm:$0xff] }
 0x3cb   :  { %v654_v12 = vpack.c.bf16 %v594_v11, %v591_v8 }
 0x3cd   :  { %1486 = vmatprep.mubr.bf16.mxu0 %v654_v12 }
 0x3ce   :  { %1487 = vmatmul.mubr.bf16.vlgmr.msra.gmra.mrb[32].mxu0 %v655_v10 }
 0x3cf   :  { %v1460_v13 = vpop.f32.mrb[20].mxu1 }
 0x3d0   :  { %v607_v14 = vpop.f32.mrb[21].mxu1 }
 0x3d1   :  { %v1461_v15 = vpop.f32.mrb[22].mxu1 }
 0x3d2   :  { %v657_v16 = vpack.c.bf16 %v1461_v15, %v1460_v13  ;;  %v610_v17 = vpop.f32.mrb[23].mxu1 }
 0x3d3   :  { %v656_v18 = vpack.c.bf16 %v610_v17, %v607_v14 }
 0x3d5   :  { %1490 = vmatprep.mubr.bf16.mxu0 %v656_v18 }
 0x3d6   :  { %1491 = vmatmul.mubr.bf16.gmra.mrb[36].mxu0 %v657_v16 }
 0x3d7   :  { %v1464_v19 = vpop.f32.mrb[24].mxu1 }
 0x3d8   :  { %v623_v20 = vpop.f32.mrb[25].mxu1 }
 0x3d9   :  { %v1465_v21 = vpop.f32.mrb[26].mxu1 }
 0x3da   :  { %v659_v22 = vpack.c.bf16 %v1465_v21, %v1464_v19  ;;  %v626_v23 = vpop.f32.mrb[27].mxu1 }
 0x3db   :  { %v658_v24 = vpack.c.bf16 %v626_v23, %v623_v20 }
 0x3dd   :  { %1494 = vmatprep.mubr.bf16.mxu0 %v658_v24 }
 0x3de   :  { %1495 = vmatmul.mubr.bf16.gmra.mrb[40].mxu0 %v659_v22 }
 0x3df   :  { %v1468_v25 = vpop.f32.mrb[28].mxu1 }
 0x3e0   :  { %v639_v26 = vpop.f32.mrb[29].mxu1 }
 0x3e1   :  { %v1469_v27 = vpop.f32.mrb[30].mxu1 }
 0x3e2   :  { %v661_v28 = vpack.c.bf16 %v1469_v27, %v1468_v25  ;;  %v642_v29 = vpop.f32.mrb[31].mxu1 }
 0x3e3   :  { %v660_v30 = vpack.c.bf16 %v642_v29, %v639_v26 }
 0x3e5   :  { %1498 = vmatprep.mubr.bf16.mxu0 %v660_v30 }
 0x3e6   :  { %1499 = vmatmul.mubr.bf16.gmra.mrb[44].mxu0 %v661_v28 }
 0x4a1   :  { %v1488_v33 = vpop.f32.mrb[32].mxu0 }
 0x4a2   :  { %v761_v35 = vpop.f32.mrb[33].mxu0  ;;  %v826_v37 = vmax.f32 %v1488_v33, 0.0 }
 0x4a3   :  { %v1489_v36 = vpop.f32.mrb[34].mxu0  ;;  %v824_v42 = vmax.f32 %v761_v35, 0.0 }
 0x4a4   :  { %v827_v38 = vmax.f32 %v1489_v36, 0.0  ;;  %v764_v39 = vpop.f32.mrb[35].mxu0 }
 0x4a5   :  { %v825_v43 = vmax.f32 %v764_v39, 0.0 }
 0x4a6   :  { %v841_v44 = vpack.c.bf16 %v827_v38, %v826_v37 }
 0x4a7   :  { %v840_v45 = vpack.c.bf16 %v825_v43, %v824_v42 }
 0x4a9   :  { %v1492_v48 = vpop.f32.mrb[36].mxu0  ;;  %1518 = vmatprep.mubr.bf16.mxu1 %v840_v45 }
 0x4aa   :  { %v777_v49 = vpop.f32.mrb[37].mxu0  ;;  %1519 = vmatmul.mubr.bf16.vlgmr.msra.gmra.mrb[32].mxu1 %v841_v44  ;;  %v830_v51 = vmax.f32 %v1492_v48, 0.0 }
 0x4ab   :  { %v1493_v50 = vpop.f32.mrb[38].mxu0  ;;  %v828_v57 = vmax.f32 %v777_v49, 0.0 }
 0x4ac   :  { %v831_v54 = vmax.f32 %v1493_v50, 0.0  ;;  %v780_v55 = vpop.f32.mrb[39].mxu0 }
 0x4ad   :  { %v829_v58 = vmax.f32 %v780_v55, 0.0 }
 0x4ae   :  { %v843_v59 = vpack.c.bf16 %v831_v54, %v830_v51 }
 0x4af   :  { %v842_v60 = vpack.c.bf16 %v829_v58, %v828_v57 }
 0x4b1   :  { %v1496_v61 = vpop.f32.mrb[40].mxu0  ;;  %1522 = vmatprep.mubr.bf16.mxu1 %v842_v60 }
 0x4b2   :  { %v793_v62 = vpop.f32.mrb[41].mxu0  ;;  %1523 = vmatmul.mubr.bf16.gmra.mrb[36].mxu1 %v843_v59  ;;  %v834_v0 = vmax.f32 %v1496_v61, 0.0 }
 0x4b3   :  { %v1497_v63 = vpop.f32.mrb[42].mxu0  ;;  %v832_v3 = vmax.f32 %v793_v62, 0.0 }
 0x4b4   :  { %v835_v1 = vmax.f32 %v1497_v63, 0.0  ;;  %v796_v2 = vpop.f32.mrb[43].mxu0 }
 0x4b5   :  { %v833_v4 = vmax.f32 %v796_v2, 0.0 }
 0x4b6   :  { %v845_v34 = vpack.c.bf16 %v835_v1, %v834_v0 }
 0x4b7   :  { %v844_v5 = vpack.c.bf16 %v833_v4, %v832_v3 }
 0x4b9   :  { %v1500_v6 = vpop.f32.mrb[44].mxu0  ;;  %1526 = vmatprep.mubr.bf16.mxu1 %v844_v5 }
 0x4ba   :  { %v809_v7 = vpop.f32.mrb[45].mxu0  ;;  %1527 = vmatmul.mubr.bf16.gmra.mrb[40].mxu1 %v845_v34  ;;  %v838_v41 = vmax.f32 %v1500_v6, 0.0 }
 0x4bb   :  { %v1501_v40 = vpop.f32.mrb[46].mxu0  ;;  %v836_v52 = vmax.f32 %v809_v7, 0.0 }
 0x4bc   :  { %v839_v46 = vmax.f32 %v1501_v40, 0.0  ;;  %v812_v47 = vpop.f32.mrb[47].mxu0 }
 0x4bd   :  { %v837_v53 = vmax.f32 %v812_v47, 0.0 }
 0x4be   :  { %v847_v56 = vpack.c.bf16 %v839_v46, %v838_v41 }
 0x4bf   :  { %v846_v8 = vpack.c.bf16 %v837_v53, %v836_v52 }
 0x4c1   :  { %1530 = vmatprep.mubr.bf16.mxu1 %v846_v8 }
 0x4c2   :  { %1531 = vmatmul.mubr.bf16.gmra.mrb[44].mxu1 %v847_v56 }
 0x57d   :  { %v1520_v10 = vpop.f32.mrb[32].mxu1 }
 0x57e   :  { %v962_v11 = vadd.f32 %v1520_v10, %v1237_v9  ;;  %v953_v12 = vpop.f32.mrb[33].mxu1 }
 0x57f   :  { %v954_v13 = vadd.f32 %v1237_v9, %v953_v12  ;;  %v1521_v14 = vpop.f32.mrb[34].mxu1 }
 0x580   :  { %1020 = vmax.xlane.f32.xlu1 %v962_v11  ;;  %v956_v15 = vpop.f32.mrb[35].mxu1  ;;  %v965_v16 = vadd.f32 %v1521_v14, %v1237_v9 }
 0x581   :  { %1016 = vmax.xlane.f32.xlu0 %v954_v13  ;;  %v957_v17 = vadd.f32 %v1237_v9, %v956_v15 }
 0x584   :  { %1022 = vmax.xlane.f32.xlu1 %v965_v16 }
 0x585   :  { %v1524_v18 = vpop.f32.mrb[36].mxu1  ;;  %1018 = vmax.xlane.f32.xlu0 %v957_v17 }
 0x586   :  { %v978_v19 = vadd.f32 %v1524_v18, %v1237_v9  ;;  %v969_v20 = vpop.f32.mrb[37].mxu1 }
 0x587   :  { %v1525_v21 = vpop.f32.mrb[38].mxu1  ;;  %v970_v24 = vadd.f32 %v1237_v9, %v969_v20 }
 0x588   :  { %v981_v22 = vadd.f32 %v1525_v21, %v1237_v9  ;;  %v972_v23 = vpop.f32.mrb[39].mxu1 }
 0x589   :  { %1028 = vmax.xlane.f32.xlu0 %v978_v19  ;;  %v973_v25 = vadd.f32 %v1237_v9, %v972_v23 }
 0x58a   :  { %1030 = vmax.xlane.f32.xlu1 %v981_v22 }
 0x58d   :  { %v1528_v26 = vpop.f32.mrb[40].mxu1  ;;  %1024 = vmax.xlane.f32.xlu0 %v970_v24 }
 0x58e   :  { %v994_v27 = vadd.f32 %v1528_v26, %v1237_v9  ;;  %v985_v28 = vpop.f32.mrb[41].mxu1  ;;  %1026 = vmax.xlane.f32.xlu1 %v973_v25 }
 0x58f   :  { %v1529_v29 = vpop.f32.mrb[42].mxu1  ;;  %v986_v32 = vadd.f32 %v1237_v9, %v985_v28 }
 0x590   :  { %v997_v30 = vadd.f32 %v1529_v29, %v1237_v9  ;;  %v988_v31 = vpop.f32.mrb[43].mxu1 }
 0x591   :  { %1036 = vmax.xlane.f32.xlu0 %v994_v27  ;;  %v1900_v33 = vadd.f32 %v1237_v9, %v988_v31 }
 0x592   :  { %1038 = vmax.xlane.f32.xlu1 %v997_v30 }
 0x595   :  { %1032 = vmax.xlane.f32.xlu0 %v986_v32  ;;  %v1532_v35 = vpop.f32.mrb[44].mxu1 }
 0x596   :  { %1034 = vmax.xlane.f32.xlu1 %v1900_v33  ;;  %v1001_v36 = vpop.f32.mrb[45].mxu1  ;;  %v1908_v43 = vadd.f32 %v1532_v35, %v1237_v9 }
 0x597   :  { %v1903_v37 = vadd.f32 %v1237_v9, %v1001_v36  ;;  %v1533_v38 = vpop.f32.mrb[46].mxu1 }
 0x598   :  { %v1004_v39 = vpop.f32.mrb[47].mxu1  ;;  %v1911_v44 = vadd.f32 %v1533_v38, %v1237_v9 }
 0x599   :  { %v1905_v42 = vadd.f32 %v1237_v9, %v1004_v39  ;;  %1040 = vmax.xlane.f32.xlu0 %v1903_v37 }
 0x59b   :  { %1042 = vmax.xlane.f32.xlu1 %v1905_v42 }
 0x59d   :  { %1044 = vmax.xlane.f32.xlu0 %v1908_v43 }
 0x59f   :  { %1046 = vmax.xlane.f32.xlu1 %v1911_v44 }
 0x60d   :  { %v1021_v45 = vpop.xlane.xlu1 %1020 }
 0x60e   :  { %v1915_v48 = vsub.f32 %v962_v11, %v1021_v45  ;;  %v1017_v49 = vpop.xlane.xlu0 %1016 }
 0x60f   :  { %v1917_v50 = vsub.f32 %v954_v13, %v1017_v49 }
 0x610   :  { %v1068_v51 = vmul.f32 1.442695, %v1915_v48 }
 0x611   :  { %v1064_v54 = vmul.f32 1.442695, %v1917_v50  ;;  %v1023_v55 = vpop.xlane.xlu1 %1022 }
 0x612   :  { %1566 = vpow2.f32 %v1068_v51  ;;  %v1921_v57 = vsub.f32 %v965_v16, %v1023_v55  ;;  %v1019_v58 = vpop.xlane.xlu0 %1018 }
 0x613   :  { %v1923_v59 = vsub.f32 %v957_v17, %v1019_v58  ;;  %1568 = vpow2.f32 %v1064_v54 }
 0x614   :  { %v1070_v60 = vmul.f32 1.442695, %v1921_v57 }
 0x615   :  { %v1066_v61 = vmul.f32 1.442695, %v1923_v59 }
 0x616   :  { %1570 = vpow2.f32 %v1070_v60  ;;  %v1029_v62 = vpop.xlane.xlu0 %1028 }
 0x617   :  { %v1927_v63 = vsub.f32 %v978_v19, %v1029_v62  ;;  %v1031_v0 = vpop.xlane.xlu1 %1030  ;;  %1572 = vpow2.f32 %v1066_v61 }
 0x618   :  { %v1929_v1 = vsub.f32 %v981_v22, %v1031_v0 }
 0x619   :  { %v1076_v2 = vmul.f32 1.442695, %v1927_v63 }
 0x61a   :  { %v1078_v3 = vmul.f32 1.442695, %v1929_v1  ;;  %v1025_v4 = vpop.xlane.xlu0 %1024 }
 0x61b   :  { %1574 = vpow2.f32 %v1076_v2  ;;  %v1933_v34 = vsub.f32 %v970_v24, %v1025_v4  ;;  %v1027_v5 = vpop.xlane.xlu1 %1026 }
 0x61c   :  { %v1567_v6 = vpop.eup %1566  ;;  %v1935_v7 = vsub.f32 %v973_v25, %v1027_v5  ;;  %1576 = vpow2.f32 %v1078_v3 }
 0x61d   :  { %v1072_v40 = vmul.f32 1.442695, %v1933_v34  ;;  %1100 = vadd.xlane.f32.xlu0 %v1567_v6  ;;  %v1569_v47 = vpop.eup %1568 }
 0x61e   :  { %v1074_v41 = vmul.f32 1.442695, %v1935_v7  ;;  %v1037_v46 = vpop.xlane.xlu0 %1036 }
 0x61f   :  { %1578 = vpow2.f32 %v1072_v40  ;;  %v1939_v52 = vsub.f32 %v994_v27, %v1037_v46  ;;  %v1039_v53 = vpop.xlane.xlu1 %1038 }
 0x620   :  { %v1571_v56 = vpop.eup %1570  ;;  %v1941_v8 = vsub.f32 %v997_v30, %v1039_v53  ;;  %1580 = vpow2.f32 %v1074_v41 }
 0x621   :  { %v1084_v9 = vmul.f32 1.442695, %v1939_v52  ;;  %1102 = vadd.xlane.f32.xlu1 %v1571_v56  ;;  %1096 = vadd.xlane.f32.xlu0 %v1569_v47  ;;  %v1573_v14 = vpop.eup %1572 }
 0x622   :  { %v1086_v10 = vmul.f32 1.442695, %v1941_v8  ;;  %v1033_v11 = vpop.xlane.xlu0 %1032 }
 0x623   :  { %1582 = vpow2.f32 %v1084_v9  ;;  %v1945_v12 = vsub.f32 %v986_v32, %v1033_v11  ;;  %v1035_v13 = vpop.xlane.xlu1 %1034 }
 0x624   :  { %v1948_v15 = vsub.f32 %v1900_v33, %v1035_v13  ;;  %1584 = vpow2.f32 %v1086_v10 }
 0x625   :  { %v1575_v16 = vpop.eup %1574  ;;  %v1080_v17 = vmul.f32 1.442695, %v1945_v12  ;;  %1098 = vadd.xlane.f32.xlu1 %v1573_v14 }
 0x626   :  { %v1082_v18 = vmul.f32 1.442695, %v1948_v15  ;;  %1108 = vadd.xlane.f32.xlu0 %v1575_v16  ;;  %v1041_v19 = vpop.xlane.xlu0 %1040  ;;  %v1577_v21 = vpop.eup %1576 }
 0x627   :  { %1586 = vpow2.f32 %v1080_v17  ;;  %v1953_v20 = vsub.f32 %v1903_v37, %v1041_v19 }
 0x628   :  { %v1043_v22 = vpop.xlane.xlu1 %1042  ;;  %1588 = vpow2.f32 %v1082_v18 }
 0x629   :  { %v1579_v23 = vpop.eup %1578  ;;  %v1088_v24 = vmul.f32 1.442695, %v1953_v20  ;;  %v1957_v25 = vsub.f32 %v1905_v42, %v1043_v22  ;;  %1110 = vadd.xlane.f32.xlu1 %v1577_v21 }
 0x62a   :  { %1104 = vadd.xlane.f32.xlu0 %v1579_v23  ;;  %v1045_v26 = vpop.xlane.xlu0 %1044  ;;  %v1581_v29 = vpop.eup %1580 }
 0x62b   :  { %1590 = vpow2.f32 %v1088_v24  ;;  %v1090_v27 = vmul.f32 1.442695, %v1957_v25  ;;  %v1961_v28 = vsub.f32 %v1908_v43, %v1045_v26 }
 0x62c   :  { %v1047_v30 = vpop.xlane.xlu1 %1046 }
 0x62d   :  { %v1583_v31 = vpop.eup %1582  ;;  %1592 = vpow2.f32 %v1090_v27  ;;  %v1092_v32 = vmul.f32 1.442695, %v1961_v28  ;;  %v1965_v33 = vsub.f32 %v1911_v44, %v1047_v30  ;;  %1106 = vadd.xlane.f32.xlu1 %v1581_v29 }
 0x62e   :  { %1116 = vadd.xlane.f32.xlu0 %v1583_v31  ;;  %v1585_v36 = vpop.eup %1584 }
 0x62f   :  { %1594 = vpow2.f32 %v1092_v32  ;;  %v1094_v35 = vmul.f32 1.442695, %v1965_v33 }
 0x631   :  { %v1587_v37 = vpop.eup %1586  ;;  %1596 = vpow2.f32 %v1094_v35  ;;  %1118 = vadd.xlane.f32.xlu1 %v1585_v36 }
 0x632   :  { %1112 = vadd.xlane.f32.xlu0 %v1587_v37  ;;  %v1589_v38 = vpop.eup %1588 }
 0x635   :  { %v1591_v39 = vpop.eup %1590  ;;  %1114 = vadd.xlane.f32.xlu1 %v1589_v38 }
 0x636   :  { %1120 = vadd.xlane.f32.xlu0 %v1591_v39 }
 0x637   :  { %v1593_v42 = vpop.eup %1592 }
 0x639   :  { %v1595_v43 = vpop.eup %1594  ;;  %1122 = vadd.xlane.f32.xlu1 %v1593_v42 }
 0x63a   :  { %1124 = vadd.xlane.f32.xlu0 %v1595_v43 }
 0x63b   :  { %v1597_v44 = vpop.eup %1596 }
 0x63d   :  { %1126 = vadd.xlane.f32.xlu1 %v1597_v44 }
 0x6aa   :  { %v1101_v45 = vpop.xlane.xlu0 %1100 }
 0x6ab   :  { %1598 = vlog2.f32 %v1101_v45 }
 0x6ae   :  { %v1103_v49 = vpop.xlane.xlu1 %1102  ;;  %v1097_v51 = vpop.xlane.xlu0 %1096 }
 0x6af   :  { %1600 = vlog2.f32 %v1103_v49 }
 0x6b0   :  { %1602 = vlog2.f32 %v1097_v51 }
 0x6b2   :  { %v1099_v54 = vpop.xlane.xlu1 %1098 }
 0x6b3   :  { %1604 = vlog2.f32 %v1099_v54  ;;  %v1109_v55 = vpop.xlane.xlu0 %1108 }
 0x6b4   :  { %1606 = vlog2.f32 %v1109_v55 }
 0x6b5   :  { %v1599_v58 = vpop.eup %1598 }
 0x6b6   :  { %v1133_v60 = vmul.f32 0.6931472, %v1599_v58  ;;  %v1111_v61 = vpop.xlane.xlu1 %1110 }
 0x6b7   :  { %1608 = vlog2.f32 %v1111_v61  ;;  %v1105_v62 = vpop.xlane.xlu0 %1104 }
 0x6b8   :  { %v1162_v0 = vsub.f32 %v1915_v48, %v1133_v60  ;;  %1610 = vlog2.f32 %v1105_v62 }
 0x6b9   :  { %v1601_v2 = vpop.eup %1600 }
 0x6ba   :  { %v1603_v3 = vpop.eup %1602  ;;  %1178 = vst [vmem:[%s2039_s7 + $0x10] sm:$0xff] %v1162_v0  ;;  %v1135_v4 = vmul.f32 0.6931472, %v1601_v2  ;;  %v1107_v5 = vpop.xlane.xlu1 %1106 }
 0x6bb   :  { %v1129_v6 = vmul.f32 0.6931472, %v1603_v3  ;;  %1612 = vlog2.f32 %v1107_v5  ;;  %v1117_v40 = vpop.xlane.xlu0 %1116 }
 0x6bc   :  { %v1163_v41 = vsub.f32 %v1921_v57, %v1135_v4  ;;  %1614 = vlog2.f32 %v1117_v40 }
 0x6bd   :  { %v1605_v46 = vpop.eup %1604  ;;  %v1160_v47 = vsub.f32 %v1917_v50, %v1129_v6 }
 0x6be   :  { %v1607_v53 = vpop.eup %1606  ;;  %1179 = vst [vmem:[%s2039_s7 + $0x18] sm:$0xff] %v1163_v41  ;;  %v1131_v48 = vmul.f32 0.6931472, %v1605_v46  ;;  %v1119_v56 = vpop.xlane.xlu1 %1118 }
 0x6bf   :  { %1176 = vst [vmem:[%s2039_s7] sm:$0xff] %v1160_v47  ;;  %v1141_v9 = vmul.f32 0.6931472, %v1607_v53  ;;  %1616 = vlog2.f32 %v1119_v56  ;;  %v1113_v10 = vpop.xlane.xlu0 %1112 }
 0x6c0   :  { %v1161_v57 = vsub.f32 %v1923_v59, %v1131_v48  ;;  %1618 = vlog2.f32 %v1113_v10 }
 0x6c1   :  { %v1609_v11 = vpop.eup %1608  ;;  %v1166_v50 = vsub.f32 %v1927_v63, %v1141_v9 }
 0x6c2   :  { %v1611_v13 = vpop.eup %1610  ;;  %1177 = vst [vmem:[%s2039_s7 + $0x8] sm:$0xff] %v1161_v57  ;;  %v1143_v14 = vmul.f32 0.6931472, %v1609_v11  ;;  %v1115_v16 = vpop.xlane.xlu1 %1114 }
 0x6c3   :  { %1182 = vst [vmem:[%s2039_s7 + $0x30] sm:$0xff] %v1166_v50  ;;  %v1137_v17 = vmul.f32 0.6931472, %v1611_v13  ;;  %1620 = vlog2.f32 %v1115_v16  ;;  %v1121_v18 = vpop.xlane.xlu0 %1120 }
 0x6c4   :  { %v1167_v59 = vsub.f32 %v1929_v1, %v1143_v14  ;;  %1622 = vlog2.f32 %v1121_v18 }
 0x6c5   :  { %v1613_v19 = vpop.eup %1612  ;;  %v1164_v63 = vsub.f32 %v1933_v34, %v1137_v17 }
 0x6c6   :  { %v1615_v21 = vpop.eup %1614  ;;  %1183 = vst [vmem:[%s2039_s7 + $0x38] sm:$0xff] %v1167_v59  ;;  %v1139_v22 = vmul.f32 0.6931472, %v1613_v19  ;;  %v1123_v23 = vpop.xlane.xlu1 %1122 }
 0x6c7   :  { %1180 = vst [vmem:[%s2039_s7 + $0x20] sm:$0xff] %v1164_v63  ;;  %v1149_v24 = vmul.f32 0.6931472, %v1615_v21  ;;  %1624 = vlog2.f32 %v1123_v23  ;;  %v1125_v26 = vpop.xlane.xlu0 %1124 }
 0x6c8   :  { %v1165_v1 = vsub.f32 %v1935_v7, %v1139_v22  ;;  %1626 = vlog2.f32 %v1125_v26 }
 0x6c9   :  { %v1617_v27 = vpop.eup %1616  ;;  %v1170_v34 = vsub.f32 %v1939_v52, %v1149_v24 }
 0x6ca   :  { %v1619_v29 = vpop.eup %1618  ;;  %1181 = vst [vmem:[%s2039_s7 + $0x28] sm:$0xff] %v1165_v1  ;;  %v1151_v30 = vmul.f32 0.6931472, %v1617_v27  ;;  %v1127_v31 = vpop.xlane.xlu1 %1126 }
 0x6cb   :  { %1186 = vst [vmem:[%s2039_s7 + $0x50] sm:$0xff] %v1170_v34  ;;  %v1145_v32 = vmul.f32 0.6931472, %v1619_v29  ;;  %1628 = vlog2.f32 %v1127_v31 }
 0x6cc   :  { %v1171_v35 = vsub.f32 %v1941_v8, %v1151_v30 }
 0x6cd   :  { %v1621_v7 = vpop.eup %1620  ;;  %v1168_v36 = vsub.f32 %v1945_v12, %v1145_v32 }
 0x6ce   :  { %v1623_v37 = vpop.eup %1622  ;;  %1187 = vst [vmem:[%s2039_s7 + $0x58] sm:$0xff] %v1171_v35  ;;  %v1147_v52 = vmul.f32 0.6931472, %v1621_v7 }
 0x6cf   :  { %1184 = vst [vmem:[%s2039_s7 + $0x40] sm:$0xff] %v1168_v36  ;;  %v1153_v38 = vmul.f32 0.6931472, %v1623_v37 }
 0x6d0   :  { %v1169_v39 = vsub.f32 %v1948_v15, %v1147_v52 }
 0x6d1   :  { %v1625_v42 = vpop.eup %1624  ;;  %v1172_v43 = vsub.f32 %v1953_v20, %v1153_v38 }
 0x6d2   :  { %v1627_v8 = vpop.eup %1626  ;;  %1185 = vst [vmem:[%s2039_s7 + $0x48] sm:$0xff] %v1169_v39  ;;  %v1155_v12 = vmul.f32 0.6931472, %v1625_v42 }
 0x6d3   :  { %1188 = vst [vmem:[%s2039_s7 + $0x60] sm:$0xff] %v1172_v43  ;;  %v1157_v44 = vmul.f32 0.6931472, %v1627_v8 }
 0x6d4   :  { %v1173_v45 = vsub.f32 %v1957_v25, %v1155_v12 }
 0x6d5   :  { %v1629_v49 = vpop.eup %1628  ;;  %v1174_v51 = vsub.f32 %v1961_v28, %v1157_v44 }
 0x6d6   :  { %1189 = vst [vmem:[%s2039_s7 + $0x68] sm:$0xff] %v1173_v45  ;;  %v1159_v15 = vmul.f32 0.6931472, %v1629_v49 }
 0x6d7   :  { %1190 = vst [vmem:[%s2039_s7 + $0x70] sm:$0xff] %v1174_v51 }
 0x6d8   :  { %v1175_v20 = vsub.f32 %v1965_v33, %v1159_v15 }
 0x6da   :  { %1191 = vst [vmem:[%s2039_s7 + $0x78] sm:$0xff] %v1175_v20 }

</bundles_post_ra>
